<compile_context>
chip_gen: v7x
topology: tpu7x:2x2x1
jax: 0.10.0
libtpu: 0.0.40
codegen_flags: <defaults>
</compile_context>

<pallas_src>
import functools

import jax
import jax.numpy as jnp
import numpy as np
from jax import lax
from jax.experimental import pallas as pl
from jax.experimental.pallas import tpu as pltpu


def _round_up(n, m):
    return (n + m - 1) // m * m


def _make_kernel(K, Cin, C, offs, tap1, tap2, R, TB):
    """Builds the per-tile kernel as a closure over static layout constants."""
    off_w1, off_b1, off_w2, off_b2, off_fcw = offs
    R1 = R - (K - 1)          # conv1 rows kept inside the tile
    R2 = R - 2 * (K - 1)      # conv2 rows kept inside the tile

    def kernel(x_ref, p_ref, mavgt_ref, fcb_ref, o_ref, h1_ref):
        # x_ref    : (TB*S, Cin) batch-flattened input tile, channels on lanes
        # p_ref    : (P, C)      packed params (w1 taps | b1 | w2 taps | b2 | fcw row)
        # mavgt_ref: (R2, TB)    transposed per-batch masked-mean matrix (constant)
        # fcb_ref  : (1, 1) SMEM fc bias scalar
        # o_ref    : (1, 1, TB)  lane-dense per-tile output
        # h1_ref   : (R1, C)     VMEM scratch for conv1 activations

        # ---- conv1 + ReLU: K accumulated MXU dots over shifted ref windows ----
        acc1 = jnp.dot(x_ref[0:R1, :], p_ref[off_w1:off_w1 + Cin, :],
                       preferred_element_type=jnp.float32)
        for k in range(1, K):
            wk = p_ref[off_w1 + k * tap1:off_w1 + k * tap1 + Cin, :]
            acc1 = acc1 + jnp.dot(x_ref[k:k + R1, :], wk,
                                  preferred_element_type=jnp.float32)
        h1_ref[...] = jnp.maximum(acc1 + p_ref[off_b1:off_b1 + 1, :], 0.0)

        # ---- conv2 + ReLU: K accumulated MXU dots over shifted scratch windows ----
        acc2 = jnp.dot(h1_ref[0:R2, :], p_ref[off_w2:off_w2 + C, :],
                       preferred_element_type=jnp.float32)
        for k in range(1, K):
            wk = p_ref[off_w2 + k * tap2:off_w2 + k * tap2 + C, :]
            acc2 = acc2 + jnp.dot(h1_ref[k:k + R2, :], wk,
                                  preferred_element_type=jnp.float32)
        h2 = jnp.maximum(acc2 + p_ref[off_b2:off_b2 + 1, :], 0.0)        # (R2, C)

        # ---- fc weight on the MXU: s[r] = sum_c h2[r, c] * fcw[c]  (NT matmul) ----
        fcw_row = p_ref[off_fcw:off_fcw + 1, :]                           # (1, C)
        s = lax.dot_general(h2, fcw_row, (((1,), (1,)), ((), ())),
                            preferred_element_type=jnp.float32)           # (R2, 1)

        # ---- masked per-batch mean over the valid conv2 window + fc bias ----
        # out[0, b] = (1/L2) * sum_{t valid} s[b*S + t]   (VPU mult + sublane reduce)
        out = jnp.sum(mavgt_ref[...] * s, axis=0, keepdims=True) + fcb_ref[0, 0]

        # ---- dropout: identity (inference semantics) ----
        # TODO(synk): training-mode dropout (PRNG mask + 1/(1-p) scaling) not implemented.

        # Lane-dense store: batch on the lane axis.
        o_ref[...] = out[None].astype(o_ref.dtype)                        # (1, 1, TB)

    return kernel


@functools.partial(jax.jit, static_argnames=("batch_tile",))
def cnn_forward(x, w1, b1, w2, b2, fcw, fcb, *, batch_tile=2):
    """x: (B, S, Cin); w1: (K, Cin, C); b1: (1, C); w2: (K, C, C); b2: (1, C);
    fcw: (C, 1); fcb: (1, 1).  Returns (B, 1) float32."""
    B, S, Cin = x.shape
    K, _, C = w1.shape
    L1 = S - K + 1
    L2 = L1 - K + 1
    assert L2 >= 1, "seq_len too short for two valid convolutions"
    TB = int(batch_tile)
    assert B % TB == 0, "batch must be divisible by batch_tile"
    num_tiles = B // TB

    R = TB * S                      # rows per tile (batch-flattened time)
    R1 = R - (K - 1)
    R2 = R - 2 * (K - 1)

    # ---- wrapper-side layout plumbing (constant-folded / fused under jit) ----
    x_flat = x.reshape(B * S, Cin).astype(jnp.float32)

    # Pack every parameter into one (P, C) VMEM array; each segment (and each conv
    # tap) starts on an 8-row sublane boundary so all in-kernel slices are aligned.
    tap1 = _round_up(Cin, 8)
    tap2 = _round_up(C, 8)

    def pad_rows(a, rows):
        a = a.astype(jnp.float32)
        r = a.shape[0]
        if r == rows:
            return a
        return jnp.concatenate([a, jnp.zeros((rows - r, a.shape[1]), jnp.float32)], 0)

    w1_blk = jnp.concatenate([pad_rows(w1[k], tap1) for k in range(K)], axis=0)
    w2_blk = jnp.concatenate([pad_rows(w2[k], tap2) for k in range(K)], axis=0)
    b1_blk = pad_rows(b1, 8)
    b2_blk = pad_rows(b2, 8)
    fcw_blk = pad_rows(fcw.reshape(1, C), 8)

    off_w1 = 0
    off_b1 = off_w1 + K * tap1
    off_w2 = off_b1 + 8
    off_b2 = off_w2 + K * tap2
    off_fcw = off_b2 + 8
    params = jnp.concatenate([w1_blk, b1_blk, w2_blk, b2_blk, fcw_blk], axis=0)
    P = off_fcw + 8                 # static row count of the packed params

    # Transposed per-batch masked-mean matrix (compile-time constant): row r of a
    # tile is local batch b, local time t = r - b*S; keep t in [0, L2), weight 1/L2.
    r_idx = np.arange(R2)[:, None]
    t_idx = r_idx - np.arange(TB)[None, :] * S
    mavgT = jnp.asarray(((t_idx >= 0) & (t_idx < L2)).astype(np.float32) / float(L2))

    fcb32 = fcb.reshape(1, 1).astype(jnp.float32)

    kernel = _make_kernel(K, Cin, C, (off_w1, off_b1, off_w2, off_b2, off_fcw),
                          tap1, tap2, R, TB)

    # Rough per-tile VMEM need (double-buffered input tile + params + scratch),
    # with generous headroom; well below every generation's physical VMEM.
    tile_bytes = 4 * (2 * R * Cin + P * C + R2 * TB + R1 * C + 4 * R * C)
    vmem_limit = int(min(32 * 1024 * 1024, max(4 * 1024 * 1024, 8 * tile_bytes)))

    out = pl.pallas_call(
        kernel,
        out_shape=jax.ShapeDtypeStruct((num_tiles, 1, TB), jnp.float32),
        grid=(num_tiles,),
        in_specs=[
            pl.BlockSpec((R, Cin), lambda b: (b, 0)),               # x tile
            pl.BlockSpec((P, C), lambda b: (0, 0)),                 # packed params
            pl.BlockSpec((R2, TB), lambda b: (0, 0)),               # masked-mean matrix
            pl.BlockSpec(memory_space=pltpu.MemorySpace.SMEM),      # fc bias scalar
        ],
        out_specs=pl.BlockSpec((1, 1, TB), lambda b: (b, 0, 0)),
        scratch_shapes=[pltpu.VMEM((R1, C), jnp.float32)],          # conv1 activations
        compiler_params=pltpu.CompilerParams(
            dimension_semantics=("parallel",),
            vmem_limit_bytes=vmem_limit),
    )(x_flat, params, mavgT, fcb32)

    return out.reshape(B, 1)


def reference_forward(x, w1, b1, w2, b2, fcw, fcb):
    """Plain-JAX reference of the same math (for a sanity check)."""
    B, S, Cin = x.shape
    K, _, C = w1.shape
    L1 = S - K + 1
    L2 = L1 - K + 1
    acc1 = sum(jnp.einsum("bti,io->bto", x[:, k:k + L1, :], w1[k]) for k in range(K))
    h1 = jax.nn.relu(acc1 + b1[None])
    acc2 = sum(jnp.einsum("bti,io->bto", h1[:, k:k + L2, :], w2[k]) for k in range(K))
    h2 = jax.nn.relu(acc2 + b2[None])
    m = jnp.mean(h2, axis=1)
    return m @ fcw + fcb


if __name__ == "__main__":
    # Small, module-consistent shapes.
    batch, seq_len = 4, 16
    input_size, num_channels, kernel_size = 8, 16, 3   # dropout_rate unused at inference

    key = jax.random.PRNGKey(0)
    ks = jax.random.split(key, 7)

    # Deterministic parameter init (PyTorch-style uniform +/- 1/sqrt(fan_in)).
    # Conv weights stored as (K, Cin, Cout) == torch conv.weight transposed to (2, 1, 0).
    s1 = 1.0 / np.sqrt(input_size * kernel_size)
    s2 = 1.0 / np.sqrt(num_channels * kernel_size)
    s3 = 1.0 / np.sqrt(num_channels)
    w1 = jax.random.uniform(ks[0], (kernel_size, input_size, num_channels),
                            jnp.float32, -s1, s1)
    b1 = jax.random.uniform(ks[1], (1, num_channels), jnp.float32, -s1, s1)
    w2 = jax.random.uniform(ks[2], (kernel_size, num_channels, num_channels),
                            jnp.float32, -s2, s2)
    b2 = jax.random.uniform(ks[3], (1, num_channels), jnp.float32, -s2, s2)
    fcw = jax.random.uniform(ks[4], (num_channels, 1), jnp.float32, -s3, s3)
    fcb = jax.random.uniform(ks[5], (1, 1), jnp.float32, -s3, s3)

    # Input in (batch, seq_len, input_size) layout (what the PyTorch model receives).
    x = jax.random.normal(ks[6], (batch, seq_len, input_size), jnp.float32)

    out = jax.block_until_ready(cnn_forward(x, w1, b1, w2, b2, fcw, fcb, batch_tile=2))
    ref = jax.block_until_ready(reference_forward(x, w1, b1, w2, b2, fcw, fcb))

    assert out.shape == (batch, 1)
    np.testing.assert_allclose(np.asarray(out), np.asarray(ref), rtol=1e-5, atol=1e-5)
    print("KERNEL_OK")
</pallas_src>

<mosaic_0001>
module attributes {stable_mosaic.version = 11 : i64} {
  func.func @kernel(%arg0: i32, %arg1: memref<32x8xf32, #tpu.memory_space<vmem>>, %arg2: memref<96x16xf32, #tpu.memory_space<vmem>>, %arg3: memref<28x2xf32, #tpu.memory_space<vmem>>, %arg4: memref<1x1xf32, #tpu.memory_space<smem>>, %arg5: memref<1x1x2xf32, #tpu.memory_space<vmem>>, %arg6: memref<30x16xf32, #tpu.memory_space<vmem>>) attributes {dimension_semantics = [#tpu.dimension_semantics<parallel>], iteration_bounds = array<i64: 2>, scalar_prefetch = 0 : i64, scratch_operands = 1 : i64, tpu.core_type = #tpu.core_type<tc>, window_params = [{transform_indices = @transform_0, window_bounds = array<i64: 32, 8>}, {pipeline_mode = #tpu.pipeline_mode<synchronous>, transform_indices = @transform_1, window_bounds = array<i64: 96, 16>}, {pipeline_mode = #tpu.pipeline_mode<synchronous>, transform_indices = @transform_2, window_bounds = array<i64: 28, 2>}, {transform_indices = @transform_3, window_bounds = array<i64: 1, 1>}, {transform_indices = @transform_4, window_bounds = array<i64: 1, 1, 2>}]} {
    %c0 = arith.constant 0 : index
    %c0_0 = arith.constant 0 : index
    %0 = vector.load %arg1[%c0, %c0_0] : memref<32x8xf32, #tpu.memory_space<vmem>>, vector<30x8xf32>
    %c0_1 = arith.constant 0 : index
    %c0_2 = arith.constant 0 : index
    %1 = vector.load %arg2[%c0_1, %c0_2] : memref<96x16xf32, #tpu.memory_space<vmem>>, vector<8x16xf32>
    %cst = arith.constant dense<0.000000e+00> : vector<30x16xf32>
    %2 = tpu.matmul %0, %1, %cst {dimension_numbers = #tpu.dot_dimension_numbers<[1], [0], [0], [1], [0, 0, 1, 1], [], []>} : vector<30x8xf32>, vector<8x16xf32>, vector<30x16xf32> -> vector<30x16xf32>
    %c8 = arith.constant 8 : index
    %c0_3 = arith.constant 0 : index
    %3 = vector.load %arg2[%c8, %c0_3] : memref<96x16xf32, #tpu.memory_space<vmem>>, vector<8x16xf32>
    %c1 = arith.constant 1 : index
    %c0_4 = arith.constant 0 : index
    %4 = vector.load %arg1[%c1, %c0_4] : memref<32x8xf32, #tpu.memory_space<vmem>>, vector<30x8xf32>
    %cst_5 = arith.constant dense<0.000000e+00> : vector<30x16xf32>
    %5 = tpu.matmul %4, %3, %cst_5 {dimension_numbers = #tpu.dot_dimension_numbers<[1], [0], [0], [1], [0, 0, 1, 1], [], []>} : vector<30x8xf32>, vector<8x16xf32>, vector<30x16xf32> -> vector<30x16xf32>
    %6 = arith.addf %2, %5 : vector<30x16xf32>
    %c16 = arith.constant 16 : index
    %c0_6 = arith.constant 0 : index
    %7 = vector.load %arg2[%c16, %c0_6] : memref<96x16xf32, #tpu.memory_space<vmem>>, vector<8x16xf32>
    %c2 = arith.constant 2 : index
    %c0_7 = arith.constant 0 : index
    %8 = vector.load %arg1[%c2, %c0_7] : memref<32x8xf32, #tpu.memory_space<vmem>>, vector<30x8xf32>
    %cst_8 = arith.constant dense<0.000000e+00> : vector<30x16xf32>
    %9 = tpu.matmul %8, %7, %cst_8 {dimension_numbers = #tpu.dot_dimension_numbers<[1], [0], [0], [1], [0, 0, 1, 1], [], []>} : vector<30x8xf32>, vector<8x16xf32>, vector<30x16xf32> -> vector<30x16xf32>
    %10 = arith.addf %6, %9 : vector<30x16xf32>
    %c24 = arith.constant 24 : index
    %c0_9 = arith.constant 0 : index
    %11 = vector.load %arg2[%c24, %c0_9] : memref<96x16xf32, #tpu.memory_space<vmem>>, vector<1x16xf32>
    %12 = vector.broadcast %11 : vector<1x16xf32> to vector<30x16xf32>
    %13 = arith.addf %10, %12 : vector<30x16xf32>
    %cst_10 = arith.constant 0.000000e+00 : f32
    %14 = vector.broadcast %cst_10 : f32 to vector<30x16xf32>
    %15 = arith.maximumf %13, %14 : vector<30x16xf32>
    %c0_11 = arith.constant 0 : index
    %c0_12 = arith.constant 0 : index
    %16 = vector.load %arg6[%c0_11, %c0_12] : memref<30x16xf32, #tpu.memory_space<vmem>>, vector<30x16xf32>
    tpu.vector_store %arg6[%c0_11, %c0_12], %15 {strides = array<i32>} : memref<30x16xf32, #tpu.memory_space<vmem>>, vector<30x16xf32>,
    %c0_13 = arith.constant 0 : index
    %c0_14 = arith.constant 0 : index
    %17 = vector.load %arg6[%c0_13, %c0_14] : memref<30x16xf32, #tpu.memory_space<vmem>>, vector<28x16xf32>
    %c32 = arith.constant 32 : index
    %c0_15 = arith.constant 0 : index
    %18 = vector.load %arg2[%c32, %c0_15] : memref<96x16xf32, #tpu.memory_space<vmem>>, vector<16x16xf32>
    %cst_16 = arith.constant dense<0.000000e+00> : vector<28x16xf32>
    %19 = tpu.matmul %17, %18, %cst_16 {dimension_numbers = #tpu.dot_dimension_numbers<[1], [0], [0], [1], [0, 0, 1, 1], [], []>} : vector<28x16xf32>, vector<16x16xf32>, vector<28x16xf32> -> vector<28x16xf32>
    %c48 = arith.constant 48 : index
    %c0_17 = arith.constant 0 : index
    %20 = vector.load %arg2[%c48, %c0_17] : memref<96x16xf32, #tpu.memory_space<vmem>>, vector<16x16xf32>
    %c1_18 = arith.constant 1 : index
    %c0_19 = arith.constant 0 : index
    %21 = vector.load %arg6[%c1_18, %c0_19] : memref<30x16xf32, #tpu.memory_space<vmem>>, vector<28x16xf32>
    %cst_20 = arith.constant dense<0.000000e+00> : vector<28x16xf32>
    %22 = tpu.matmul %21, %20, %cst_20 {dimension_numbers = #tpu.dot_dimension_numbers<[1], [0], [0], [1], [0, 0, 1, 1], [], []>} : vector<28x16xf32>, vector<16x16xf32>, vector<28x16xf32> -> vector<28x16xf32>
    %23 = arith.addf %19, %22 : vector<28x16xf32>
    %c64 = arith.constant 64 : index
    %c0_21 = arith.constant 0 : index
    %24 = vector.load %arg2[%c64, %c0_21] : memref<96x16xf32, #tpu.memory_space<vmem>>, vector<16x16xf32>
    %c2_22 = arith.constant 2 : index
    %c0_23 = arith.constant 0 : index
    %25 = vector.load %arg6[%c2_22, %c0_23] : memref<30x16xf32, #tpu.memory_space<vmem>>, vector<28x16xf32>
    %cst_24 = arith.constant dense<0.000000e+00> : vector<28x16xf32>
    %26 = tpu.matmul %25, %24, %cst_24 {dimension_numbers = #tpu.dot_dimension_numbers<[1], [0], [0], [1], [0, 0, 1, 1], [], []>} : vector<28x16xf32>, vector<16x16xf32>, vector<28x16xf32> -> vector<28x16xf32>
    %27 = arith.addf %23, %26 : vector<28x16xf32>
    %c80 = arith.constant 80 : index
    %c0_25 = arith.constant 0 : index
    %28 = vector.load %arg2[%c80, %c0_25] : memref<96x16xf32, #tpu.memory_space<vmem>>, vector<1x16xf32>
    %29 = vector.broadcast %28 : vector<1x16xf32> to vector<28x16xf32>
    %30 = arith.addf %27, %29 : vector<28x16xf32>
    %cst_26 = arith.constant 0.000000e+00 : f32
    %31 = vector.broadcast %cst_26 : f32 to vector<28x16xf32>
    %32 = arith.maximumf %30, %31 : vector<28x16xf32>
    %c88 = arith.constant 88 : index
    %c0_27 = arith.constant 0 : index
    %33 = vector.load %arg2[%c88, %c0_27] : memref<96x16xf32, #tpu.memory_space<vmem>>, vector<1x16xf32>
    %cst_28 = arith.constant dense<0.000000e+00> : vector<28x1xf32>
    %34 = tpu.matmul %32, %33, %cst_28 {dimension_numbers = #tpu.dot_dimension_numbers<[1], [1], [0], [0], [0, 0, 1, 0], [], []>} : vector<28x16xf32>, vector<1x16xf32>, vector<28x1xf32> -> vector<28x1xf32>
    %c0_29 = arith.constant 0 : index
    %c0_30 = arith.constant 0 : index
    %35 = vector.load %arg3[%c0_29, %c0_30] : memref<28x2xf32, #tpu.memory_space<vmem>>, vector<28x2xf32>
    %36 = vector.broadcast %34 : vector<28x1xf32> to vector<28x2xf32>
    %37 = arith.mulf %35, %36 : vector<28x2xf32>
    %cst_31 = arith.constant dense<0.000000e+00> : vector<2xf32>
    %38 = vector.multi_reduction <add>, %37, %cst_31 [0] : vector<28x2xf32> to vector<2xf32>
    %39 = vector.shape_cast %38 : vector<2xf32> to vector<1x2xf32>
    %c0_32 = arith.constant 0 : index
    %c0_33 = arith.constant 0 : index
    %40 = memref.load %arg4[%c0_32, %c0_33] : memref<1x1xf32, #tpu.memory_space<smem>>
    %41 = vector.broadcast %40 : f32 to vector<1x2xf32>
    %42 = arith.addf %39, %41 : vector<1x2xf32>
    %43 = vector.shape_cast %42 : vector<1x2xf32> to vector<1x1x2xf32>
    %c0_34 = arith.constant 0 : index
    %c0_35 = arith.constant 0 : index
    %c0_36 = arith.constant 0 : index
    %44 = vector.load %arg5[%c0_34, %c0_35, %c0_36] : memref<1x1x2xf32, #tpu.memory_space<vmem>>, vector<1x1x2xf32>
    tpu.vector_store %arg5[%c0_34, %c0_35, %c0_36], %43 {strides = array<i32>} : memref<1x1x2xf32, #tpu.memory_space<vmem>>, vector<1x1x2xf32>,
    return
  }
  func.func @transform_0(%arg0: i32) -> (i32, i32) {
    %c0_i32 = arith.constant 0 : i32
    %c0_i32_0 = arith.constant 0 : i32
    return %arg0, %c0_i32 : i32, i32
  }
  func.func @transform_1(%arg0: i32) -> (i32, i32) {
    %c0_i32 = arith.constant 0 : i32
    %c0_i32_0 = arith.constant 0 : i32
    %c0_i32_1 = arith.constant 0 : i32
    return %c0_i32, %c0_i32_0 : i32, i32
  }
  func.func @transform_2(%arg0: i32) -> (i32, i32) {
    %c0_i32 = arith.constant 0 : i32
    %c0_i32_0 = arith.constant 0 : i32
    %c0_i32_1 = arith.constant 0 : i32
    return %c0_i32, %c0_i32_0 : i32, i32
  }
  func.func @transform_3(%arg0: i32) -> (i32, i32) {
    %c0_i32 = arith.constant 0 : i32
    %c0_i32_0 = arith.constant 0 : i32
    %c0_i32_1 = arith.constant 0 : i32
    return %c0_i32, %c0_i32_0 : i32, i32
  }
  func.func @transform_4(%arg0: i32) -> (i32, i32, i32) {
    %c0_i32 = arith.constant 0 : i32
    %c0_i32_0 = arith.constant 0 : i32
    %c0_i32_1 = arith.constant 0 : i32
    return %arg0, %c0_i32, %c0_i32_0 : i32, i32, i32
  }
}

</mosaic_0001>

<bundles_post_ra>
// kernel: cnn_forward.1
= control target key start
LH: loop header
LB: loop body
LE: loop exit
PB: predicated region body
PF: predicated region fallthrough
CT: control target
= control target key end

     0   :  { %s1145_s17 = smov 0   ;;  %s1245_s0 = inlined_call_operand.vmem [shape: f32[64,8], index: 0, kind: input, shape index: {}]   ;;  %s1246_s1 = inlined_call_operand.vmem [shape: f32[96,16], index: 1, kind: input, shape index: {}]   ;;  %s1247_s2 = inlined_call_operand.vmem [shape: f32[28,2], index: 2, kind: input, shape index: {}]   ;;  %s1248_s3 = inlined_call_operand.<no memory space> [shape: f32[1,1], index: 3, kind: input, shape index: {}]   ;;  %s1249_s4 = inlined_call_operand.vmem [shape: f32[2,1,2], index: 4, kind: output, shape index: {}]  }
   0x1   :  { %9 = sst [smem:[#allocation3]] %s1248_s3 }
   0x2 LB: > { %s1151_s18 = sadd.s32 4294967295, %s1115_s17   ;;  %p954_p0 = scmp.ge.s32.totalorder %s1115_s17, 1  ;;  %s1115_s17 = sphi %s1145_s17, %s15_s17  }
   0x3   : > { %p164_p1 = scmp.lt.s32.totalorder %s1115_s17, 3 }
   0x5   : > { %p165_p2 = pnand %p954_p0, %p164_p1 }
   0x6   : > { %v202_v0 = vld [vmem:[%s1246_s1 + $0x8] sm:$0xff] (!%p165_p2)  ;;  %s955_s3 = sshll.u32 (!%p165_p2), %s1151_s18, 2  ;;  %v201_v1 = vld [vmem:[%s1246_s1] sm:$0xff] (!%p165_p2)  ;;  %vm207_vm0 = vcmask (!%p165_p2), 64512   ;;  %v402_v5 = vld [vmem:[%s1246_s1 + $0x10] sm:$0xff] (!%p165_p2)  ;;  %vm521_vm1 = vcmask (!%p165_p2), 130048  }
   0x7   : > { %168 = sbr.rel (%p165_p2) target bundleno = 670 (0x29e), region = 36  ;;  %1019 = vmatprep.subr.mxu0 (!%p165_p2), %v202_v0  ;;  %p189_p3 = scmp.lt.s32.totalorder (!%p165_p2), %s955_s3, 7  ;;  %v533_v15 = vld [vmem:[%s1246_s1 + $0x30] sm:$0xff] (!%p165_p2)  ;;  %v534_v16 = vld [vmem:[%s1246_s1 + $0x38] sm:$0xff] (!%p165_p2)  ;;  %v531_v18 = vld [vmem:[%s1246_s1 + $0x20] sm:$0xff] (!%p165_p2)  ;;  %vm525_vm2 = vcmask (!%p165_p2), 128000  }
   0x8   : > { %1020 = vmatpush3.msra.mxu0 (!%p165_p2), %v202_v0  ;;  %v1073_v17 = vpack.c.bf16 (!%p165_p2), %v534_v16, %v533_v15  ;;  %v532_v19 = vld [vmem:[%s1246_s1 + $0x28] sm:$0xff] (!%p165_p2)  ;;  %v969_v21 = vld [vmem:[%s1246_s1 + $0x18] ss:$0 sm:$0xff] (!%p165_p2)  ;;  %v733_v35 = vld [vmem:[%s1246_s1 + $0x40] sm:$0xff] (!%p165_p2)  ;;  %vm871_vm3 = vcmask (!%p165_p2), 125952   ;;  %vm883_vm4 = vcmask (!%p165_p2), 15360  }
   0x9   : > { %1027 = vmatprep.subr.mxu0 (!%p165_p2), %v201_v1  ;;  %v1077_v20 = vpack.c.bf16 (!%p165_p2), %v532_v19, %v531_v18  ;;  %v734_v36 = vld [vmem:[%s1246_s1 + $0x48] sm:$0xff] (!%p165_p2)  ;;  %v982_v49 = vld [vmem:[%s1246_s1 + $0x50] ss:$0 sm:$0xff] (!%p165_p2)  ;;  %v983_v54 = vld [vmem:[%s1246_s1 + $0x58] ss:$0 sm:$0xff] (!%p165_p2)  ;;  %vm889_vm5 = vcmask (!%p165_p2), 11264  }
   0xa   : > { %1074 = vmatprep.subr.bf16.mxu1 (!%p165_p2), %v1073_v17  ;;  %v1081_v37 = vpack.c.bf16 (!%p165_p2), %v734_v36, %v733_v35  ;;  %v878_v16 = vld [vmem:[%s1247_s2 + $0x18] sm:$0xf] (!%p165_p2)  ;;  %s898_s30 = sld [smem:[#allocation3]] (!%p165_p2)  ;;  %p194_p4 = scmp.lt.s32.totalorder (!%p165_p2), %s1151_s18, 1  ;;  %vm901_vm6 = vcmask (!%p165_p2), 8192  }
   0xb   : > { %1076 = vmatpush3.bf16.msra.mxu1 (!%p165_p2), %v1073_v17 }
   0xc   : > { %1078 = vmatprep.subr.bf16.mxu1 (!%p165_p2), %v1077_v20 }
   0xe   : > { %s1251_s3 = smov (!%p189_p3, %s955_s3), 7  ;;  %s1253_s18 = smov (!%p194_p4, %s1151_s18), 1 }
   0xf   : > { %s956_s23 = sshll.u32 %s1251_s3, 3  ;;  %s196_s7 = scalar_lea.vmem %s1249_s4, %s1253_s18 }
  0x10   : > { %s192_s26 = scalar_lea.vmem %s1245_s0, %s956_s23 }
  0x11   : > { %v203_v2 = vld [vmem:[%s192_s26 + $0x1] sm:$0xff]  ;;  %v204_v3 = vld [vmem:[%s192_s26 + $0x9] sm:$0xff]  ;;  %v205_v4 = vld [vmem:[%s192_s26 + $0x11] sm:$0xff] }
  0x12   : > { %1021 = vmatprep.mubr.msk.f32.mxu0 %vm207_vm0, %v203_v2  ;;  %v206_v6 = vld [vmem:[%s192_s26 + $0x19] sm:$0x3f]  ;;  %v197_v7 = vld [vmem:[%s192_s26] sm:$0xff]  ;;  %v198_v8 = vld [vmem:[%s192_s26 + $0x8] sm:$0xff] }
  0x13   : > { %1022 = vmatmul.mubr.msk.f32.vlgmr.msra.gmra.mrb[0].mxu0 %vm207_vm0, %v204_v3  ;;  %v199_v9 = vld [vmem:[%s192_s26 + $0x10] sm:$0xff]  ;;  %v200_v10 = vld [vmem:[%s192_s26 + $0x18] sm:$0x3f]  ;;  %v403_v11 = vld [vmem:[%s192_s26 + $0x2] sm:$0xff] }
  0x14   : > { %1028 = vmatpush3.msra.mxu0 %v201_v1  ;;  %1024 = vmatprep.mubr.msk.f32.mxu0 %vm207_vm0, %v205_v4  ;;  %v404_v12 = vld [vmem:[%s192_s26 + $0xa] sm:$0xff]  ;;  %v405_v13 = vld [vmem:[%s192_s26 + $0x12] sm:$0xff]  ;;  %v406_v14 = vld [vmem:[%s192_s26 + $0x1a] sm:$0x3f] }
  0x15   : > { %1035 = vmatprep.subr.mxu0 %v402_v5 }
  0x17   : > { %1025 = vmatmul.mubr.msk.f32.gmra.mrb[2].mxu0 %vm207_vm0, %v206_v6 }
  0x18   : > { %1029 = vmatprep.mubr.msk.f32.mxu0 %vm207_vm0, %v197_v7  ;;  %v875_v7 = vld [vmem:[%s1247_s2] sm:$0xff] }
  0x1b   : > { %1030 = vmatmul.mubr.msk.f32.vlgmr.msra.gmra.mrb[0].mxu0 %vm207_vm0, %v198_v8 }
  0x1c   : > { %1036 = vmatpush3.msra.mxu0 %v402_v5  ;;  %1032 = vmatprep.mubr.msk.f32.mxu0 %vm207_vm0, %v199_v9  ;;  %v876_v9 = vld [vmem:[%s1247_s2 + $0x8] sm:$0xff] }
  0x1f   : > { %1033 = vmatmul.mubr.msk.f32.gmra.mrb[2].mxu0 %vm207_vm0, %v200_v10  ;;  %v877_v10 = vld [vmem:[%s1247_s2 + $0x10] sm:$0xff] }
  0x20   : > { %1037 = vmatprep.mubr.msk.f32.mxu0 %vm207_vm0, %v403_v11 }
  0x23   : > { %1038 = vmatmul.mubr.msk.f32.vlgmr.msra.gmra.mrb[0].mxu0 %vm207_vm0, %v404_v12 }
  0x24   : > { %1040 = vmatprep.mubr.msk.f32.mxu0 %vm207_vm0, %v405_v13 }
  0x27   : > { %1041 = vmatmul.mubr.msk.f32.gmra.mrb[2].mxu0 %vm207_vm0, %v406_v14 }
  0xf6   : > { %v1039_v22 = vpop.f32.mrb[0].mxu0 }
  0xf7   : > { %v514_v23 = vadd.f32 %v1039_v22, %v969_v21  ;;  %v485_v24 = vpop.f32.mrb[1].mxu0 }
  0xf8   : > { %v513_v25 = vadd.f32 %v969_v21, %v485_v24 }
  0xf9   : > { %v518_v26 = vmax.f32 %v514_v23, 0.0 }
  0xfa   : > { %v517_v27 = vmax.f32 %v513_v25, 0.0  ;;  %v1042_v28 = vpop.f32.mrb[2].mxu0 }
  0xfb   : > { %523 = vst.msk [vmem:[#allocation2 + $0x8] sm:$0xff] %vm521_vm1, %v518_v26  ;;  %v516_v29 = vadd.f32 %v1042_v28, %v969_v21  ;;  %v495_v30 = vpop.f32.mrb[3].mxu0 }
  0xfc   : > { %522 = vst.msk [vmem:[#allocation2] sm:$0xff] %vm521_vm1, %v517_v27  ;;  %v515_v31 = vadd.f32 %v969_v21, %v495_v30 }
  0xfd   : > { %v520_v32 = vmax.f32 %v516_v29, 0.0 }
  0xfe   : > { %v519_v33 = vmax.f32 %v515_v31, 0.0  ;;  %v899_v31 = vstv %s898_s30 }
  0xff   : > { %526 = vst.msk [vmem:[#allocation2 + $0x18] sm:$0x3f] %vm525_vm2, %v520_v32 }
 0x100   : > { %524 = vst.msk [vmem:[#allocation2 + $0x10] sm:$0xff] %vm521_vm1, %v519_v33 }
 0x102   : > { %v528_v42 = vld [vmem:[#allocation2 + $0x8] sm:$0xff] }
 0x103   : > { %v535_v34 = vld [vmem:[#allocation2 + $0x1] sm:$0xff] }
 0x104   : > { %1047 = vmatprep.mubr.msk.f32.mxu1 %vm521_vm1, %v535_v34  ;;  %v527_v41 = vld [vmem:[#allocation2] sm:$0xff] }
 0x105   : > { %v735_v45 = vld [vmem:[#allocation2 + $0x2] sm:$0xff] }
 0x106   : > { %v538_v40 = vld [vmem:[#allocation2 + $0x19] sm:$0xf] }
 0x107   : > { %v536_v38 = vld [vmem:[#allocation2 + $0x9] sm:$0xff]  ;;  %v537_v39 = vld [vmem:[#allocation2 + $0x11] sm:$0xff]  ;;  %v738_v48 = vld [vmem:[#allocation2 + $0x1a] sm:$0xf] }
 0x108   : > { %1048 = vmatmul.mubr.msk.f32.vlgmr.msra.gmra.mrb[0].mxu1 %vm521_vm1, %v536_v38  ;;  %v529_v43 = vld [vmem:[#allocation2 + $0x10] sm:$0xff]  ;;  %v530_v44 = vld [vmem:[#allocation2 + $0x18] sm:$0xf] }
 0x109   : > { %1080 = vmatpush3.bf16.msra.mxu1 %v1077_v20  ;;  %1050 = vmatprep.mubr.msk.f32.mxu1 %vm521_vm1, %v537_v39  ;;  %v736_v46 = vld [vmem:[#allocation2 + $0xa] sm:$0xff]  ;;  %v737_v47 = vld [vmem:[#allocation2 + $0x12] sm:$0xff] }
 0x10a   : > { %1082 = vmatprep.subr.bf16.mxu1 %v1081_v37 }
 0x10c   : > { %1051 = vmatmul.mubr.msk.f32.gmra.mrb[2].mxu1 %vm521_vm1, %v538_v40 }
 0x10d   : > { %1057 = vmatprep.mubr.msk.f32.mxu1 %vm521_vm1, %v527_v41 }
 0x110   : > { %1058 = vmatmul.mubr.msk.f32.vlgmr.msra.gmra.mrb[0].mxu1 %vm521_vm1, %v528_v42 }
 0x111   : > { %1084 = vmatpush3.bf16.msra.mxu1 %v1081_v37  ;;  %1060 = vmatprep.mubr.msk.f32.mxu1 %vm521_vm1, %v529_v43 }
 0x114   : > { %1061 = vmatmul.mubr.msk.f32.gmra.mrb[2].mxu1 %vm521_vm1, %v530_v44 }
 0x115   : > { %1067 = vmatprep.mubr.msk.f32.mxu1 %vm521_vm1, %v735_v45 }
 0x118   : > { %1068 = vmatmul.mubr.msk.f32.vlgmr.msra.gmra.mrb[0].mxu1 %vm521_vm1, %v736_v46 }
 0x119   : > { %1070 = vmatprep.mubr.msk.f32.mxu1 %vm521_vm1, %v737_v47 }
 0x11c   : > { %1071 = vmatmul.mubr.msk.f32.gmra.mrb[2].mxu1 %vm521_vm1, %v738_v48 }
 0x1eb   : > { %v1069_v50 = vpop.f32.mrb[0].mxu1 }
 0x1ec   : > { %v846_v51 = vadd.f32 %v1069_v50, %v982_v49  ;;  %v817_v52 = vpop.f32.mrb[1].mxu1 }
 0x1ed   : > { %v845_v53 = vadd.f32 %v982_v49, %v817_v52 }
 0x1ee   : > { %v850_v55 = vmax.f32 %v846_v51, 0.0 }
 0x1ef   : > { %v849_v56 = vmax.f32 %v845_v53, 0.0  ;;  %v1072_v57 = vpop.f32.mrb[2].mxu1 }
 0x1f0   : > { %v848_v58 = vadd.f32 %v1072_v57, %v982_v49  ;;  %v827_v59 = vpop.f32.mrb[3].mxu1  ;;  %v859_v1 = vmul.f32 %v983_v54, %v850_v55 }
 0x1f1   : > { %v847_v60 = vadd.f32 %v982_v49, %v827_v59  ;;  %v858_v61 = vmul.f32 %v983_v54, %v849_v56 }
 0x1f2   : > { %v852_v62 = vmax.f32 %v848_v58, 0.0  ;;  %v865_v3 = vsel %vm521_vm1, %v859_v1, 0.0 }
 0x1f3   : > { %v851_v63 = vmax.f32 %v847_v60, 0.0  ;;  %v862_v0 = vsel %vm521_vm1, %v858_v61, 0.0 }
 0x1f4   : > { %863 = vadd.xlane.f32.xlu0 %v862_v0  ;;  %v861_v5 = vmul.f32 %v983_v54, %v852_v62 }
 0x1f5   : > { %v860_v2 = vmul.f32 %v983_v54, %v851_v63 }
 0x1f6   : > { %v872_v6 = vsel %vm871_vm3, %v861_v5, 0.0 }
 0x1f7   : > { %v868_v4 = vsel %vm521_vm1, %v860_v2, 0.0 }
 0x1f8   : > { %866 = vadd.xlane.f32.xlu0 %v865_v3  ;;  %869 = vadd.xlane.f32.xlu1 %v868_v4 }
 0x1fc   : > { %873 = vadd.xlane.f32.xlu1 %v872_v6 }
 0x281   : > { %v864_v8 = vpop.xlane.xlu0 %863 }
 0x282   : > { %v879_v11 = vmul.f32 %v875_v7, %v864_v8 }
 0x284   : > { %v884_v17 = vsel %vm883_vm4, %v879_v11, 0.0 }
 0x285   : > { %v867_v12 = vpop.xlane.xlu0 %866  ;;  %v870_v13 = vpop.xlane.xlu1 %869 }
 0x286   : > { %v880_v14 = vmul.f32 %v876_v9, %v867_v12  ;;  %v881_v15 = vmul.f32 %v877_v10, %v870_v13 }
 0x288   : > { %v885_v18 = vsel %vm883_vm4, %v880_v14, 0.0  ;;  %v887_v21 = vsel %vm883_vm4, %v881_v15, 0.0 }
 0x289   : > { %v886_v19 = vadd.f32 %v885_v18, %v884_v17  ;;  %v874_v20 = vpop.xlane.xlu1 %873 }
 0x28a   : > { %v882_v22 = vmul.f32 %v878_v16, %v874_v20 }
 0x28b   : > { %v888_v23 = vadd.f32 %v887_v21, %v886_v19 }
 0x28c   : > { %v890_v24 = vsel %vm889_vm5, %v882_v22, 0.0 }
 0x28d   : > { %v891_v25 = vadd.f32 %v890_v24, %v888_v23 }
 0x28f   : > { %v892_v26 = vrot.slane %v891_v25, 4 }
 0x291   : > { %v893_v27 = vadd.f32 %v892_v26, %v891_v25 }
 0x293   : > { %v894_v28 = vrot.slane %v893_v27, 2 }
 0x295   : > { %v895_v29 = vadd.f32 %v894_v28, %v893_v27 }
 0x297   : > { %v896_v30 = vrot.slane %v895_v29, 1 }
 0x299   : > { %v897_v32 = vadd.f32 %v896_v30, %v895_v29 }
 0x29b   : > { %v900_v33 = vadd.f32 %v899_v31, %v897_v32 }
 0x29d   : > { %902 = vst.msk [vmem:[%s196_s7] sm:$0x1] %vm901_vm6, %v900_v33 }
 0x29e PF: > { %s15_s17 = sadd.s32 1, %s1115_s17  }
 0x29f   : > { %p12_p5 = scmp.ge.s32.totalorder %s15_s17, 4  }
 0x2a1   :  { %14 = sbr.rel (!%p12_p5) target bundleno = 2 (0x2), region = 66 }

</bundles_post_ra>
